<compile_context>
chip_gen: v7x
topology: tpu7x:2x2x1
jax: 0.10.0
libtpu: 0.0.40
codegen_flags: <defaults>
</compile_context>

<pallas_src>
import functools

import jax
import jax.numpy as jnp
from jax.experimental import pallas as pl
from jax.experimental.pallas import tpu as pltpu


def _round_up(x, m):
    return (x + m - 1) // m * m


@functools.lru_cache(maxsize=1)
def _tpu_kind() -> str:
    try:
        return jax.devices()[0].device_kind.lower()
    except Exception:
        return ""


def _is_newgen() -> bool:
    k = _tpu_kind()
    return ("v6" in k) or ("v7" in k)


# ----------------------------- Pallas kernel -------------------------------

def _head_kernel(x_ref, w1_ref, b1_ref, w2_ref, b2_ref, o_ref, *, act_dtype):
    # dropout -> dense -> tanh -> dropout -> out_proj (dropouts identity, eval)
    x = x_ref[...].astype(w1_ref.dtype)                        # bf16 MXU feed
    h = jnp.dot(x, w1_ref[...], preferred_element_type=jnp.float32)
    h = jnp.tanh((h + b1_ref[...]).astype(act_dtype))          # bf16 tanh on v6e/v7x
    y = jnp.dot(h.astype(w2_ref.dtype), w2_ref[...],
                preferred_element_type=jnp.float32)
    o_ref[...] = y + b2_ref[...]


# ----------------------------- weight prep (ONCE) ---------------------------

def prepare_whisper_head_params(dense_w, dense_b, out_w, out_b,
                                *, compute_dtype=jnp.bfloat16):
    """Pad feature axes to 128 lanes and cast weights to the MXU dtype.

    Call once at model-load time and reuse across forward calls; the per-call
    path then does zero weight re-padding / re-casting (zero padding is exact:
    padded K rows/cols contribute 0, tanh(0)=0 feeds zero out_proj rows).
    """
    D, Dh = dense_w.shape
    C = out_w.shape[1]
    Dp, Dhp, Cp = _round_up(D, 128), _round_up(Dh, 128), _round_up(C, 128)
    f32 = jnp.float32
    w1 = jnp.zeros((Dp, Dhp), compute_dtype).at[:D, :Dh].set(
        dense_w.astype(compute_dtype))
    b1 = jnp.zeros((1, Dhp), f32).at[0, :Dh].set(dense_b.astype(f32))
    w2 = jnp.zeros((Dhp, Cp), compute_dtype).at[:Dh, :C].set(
        out_w.astype(compute_dtype))
    b2 = jnp.zeros((1, Cp), f32).at[0, :C].set(out_b.astype(f32))
    return {"w1": w1, "b1": b1, "w2": w2, "b2": b2, "dims": (D, Dh, C)}


# ----------------------------- forward --------------------------------------

def whisper_classification_head(hidden_states, params, *, block_m=None,
                                bf16_tanh=None):
    """Fused dense->tanh->out_proj head.  Returns (B, num_classes) f32."""
    B, D = hidden_states.shape
    D_orig, Dh, C = params["dims"]
    assert D == D_orig, "hidden_states feature dim != prepared weight dim"
    w1, b1, w2, b2 = params["w1"], params["b1"], params["w2"], params["b2"]
    Dp, Dhp = w1.shape
    Cp = w2.shape[1]

    if block_m is None:
        block_m = 512 if _is_newgen() else 256      # v5e: stay under 16 MiB scoped
    if bf16_tanh is None:
        bf16_tanh = _is_newgen()                    # bf16 VALU/EUP only on v6e/v7x
    act_dtype = w1.dtype if bf16_tanh else jnp.float32

    # Feature axis: pass activations straight through (no copy) when already
    # lane-aligned; only toy shapes (D % 128 != 0) take the padded fallback.
    if Dp == D:
        xp = hidden_states
    else:
        xp = jnp.zeros((B, Dp), hidden_states.dtype).at[:, :D].set(hidden_states)

    # Row blocking: block must be 8/16-aligned (or span the full row axis); the
    # row axis itself is never padded — ragged last blocks are fine.
    if B >= 16:
        bm = min(block_m, (B // 16) * 16)
        if B >= 32 and pl.cdiv(B, bm) < 2:          # feed both v7x TensorCores
            bm = max(16, _round_up((B + 1) // 2, 16))
    else:
        bm = B                                      # single full-extent block
    grid_m = pl.cdiv(B, bm)

    x_bytes = hidden_states.dtype.itemsize
    w_bytes = w1.dtype.itemsize
    vmem_need = (2 * bm * Dp * x_bytes                       # x, double-buffered
                 + (Dp * Dhp + Dhp * Cp) * w_bytes           # weights, 1 buffer
                 + (Dhp + Cp) * 4                            # biases
                 + 2 * bm * Cp * 4                           # out, double-buffered
                 + 3 * bm * Dhp * 4)                         # intermediates slack
    vmem_limit = int(min(max(2 * vmem_need, 32 * 1024 * 1024), 64 * 1024 * 1024))

    cost = pl.CostEstimate(
        flops=2 * B * (Dp * Dhp + Dhp * Cp),
        transcendentals=B * Dhp,
        bytes_accessed=(B * Dp * x_bytes + (Dp * Dhp + Dhp * Cp) * w_bytes
                        + (Dhp + Cp) * 4 + B * Cp * 4))

    resident = dict(pipeline_mode=pl.Buffered(1))   # fetched once, single buffer

    out = pl.pallas_call(
        functools.partial(_head_kernel, act_dtype=act_dtype),
        out_shape=jax.ShapeDtypeStruct((B, Cp), jnp.float32),
        grid=(grid_m,),
        in_specs=[
            pl.BlockSpec((bm, Dp), lambda i: (i, 0)),               # activations
            pl.BlockSpec((Dp, Dhp), lambda i: (0, 0), **resident),  # dense W
            pl.BlockSpec((1, Dhp), lambda i: (0, 0), **resident),   # dense b
            pl.BlockSpec((Dhp, Cp), lambda i: (0, 0), **resident),  # out_proj W
            pl.BlockSpec((1, Cp), lambda i: (0, 0), **resident),    # out_proj b
        ],
        out_specs=pl.BlockSpec((bm, Cp), lambda i: (i, 0)),
        compiler_params=pltpu.CompilerParams(
            dimension_semantics=("parallel",),       # megacore on v7x
            vmem_limit_bytes=vmem_limit),
        cost_estimate=cost,
    )(xp, w1, b1, w2, b2)

    return out[:, :C]
    # TODO(synk): if input_dim ever exceeds what a single K-block tolerates,
    # add a K grid axis with an f32 VMEM accumulator before the tanh.


# ----------------------------- main -----------------------------------------

if __name__ == "__main__":
    def make_case(key, B, D, Dh, C):
        k_x, k_w1, k_b1, k_w2, k_b2 = jax.random.split(key, 5)
        x = jax.random.normal(k_x, (B, D), jnp.float32)
        w1 = 0.05 * jax.random.normal(k_w1, (D, Dh), jnp.float32)
        b1 = 0.05 * jax.random.normal(k_b1, (Dh,), jnp.float32)
        w2 = 0.05 * jax.random.normal(k_w2, (Dh, C), jnp.float32)
        b2 = 0.05 * jax.random.normal(k_b2, (C,), jnp.float32)
        return x, w1, b1, w2, b2

    def check(x, w1, b1, w2, b2):
        params = prepare_whisper_head_params(w1, b1, w2, b2)  # once, reused
        logits = whisper_classification_head(x, params)
        logits = jax.block_until_ready(logits)
        # Reference (plain JAX, f32) — dropouts are identity in eval mode.
        ref = jnp.tanh(x @ w1 + b1) @ w2 + b2
        assert logits.shape == ref.shape and logits.dtype == jnp.float32
        assert bool(jnp.all(jnp.isfinite(logits)))
        assert bool(jnp.allclose(logits, ref, atol=2e-2, rtol=2e-2)), (
            f"max abs err {float(jnp.max(jnp.abs(logits - ref)))}")

    key = jax.random.PRNGKey(0)
    k0, k1 = jax.random.split(key)
    # Small shapes consistent with the module (batch, input_dim=inner_dim, classes).
    check(*make_case(k0, B=2, D=32, Dh=32, C=3))      # padded-features fallback path
    check(*make_case(k1, B=20, D=128, Dh=128, C=3))   # no-copy, ragged-row-grid path
    print("KERNEL_OK")
</pallas_src>

<mosaic_0001>
module attributes {stable_mosaic.version = 11 : i64} {
  func.func @_head_kernel(%arg0: i32, %arg1: memref<2x128xf32, #tpu.memory_space<vmem>>, %arg2: memref<128x128xbf16, #tpu.memory_space<vmem>>, %arg3: memref<1x128xf32, #tpu.memory_space<vmem>>, %arg4: memref<128x128xbf16, #tpu.memory_space<vmem>>, %arg5: memref<1x128xf32, #tpu.memory_space<vmem>>, %arg6: memref<2x128xf32, #tpu.memory_space<vmem>>) attributes {dimension_semantics = [#tpu.dimension_semantics<parallel>], iteration_bounds = array<i64: 1>, scalar_prefetch = 0 : i64, scratch_operands = 0 : i64, tpu.core_type = #tpu.core_type<tc>, window_params = [{transform_indices = @transform_0, window_bounds = array<i64: 2, 128>}, {pipeline_mode = #tpu.pipeline_mode<synchronous>, transform_indices = @transform_1, window_bounds = array<i64: 128, 128>}, {pipeline_mode = #tpu.pipeline_mode<synchronous>, transform_indices = @transform_2, window_bounds = array<i64: 1, 128>}, {pipeline_mode = #tpu.pipeline_mode<synchronous>, transform_indices = @transform_3, window_bounds = array<i64: 128, 128>}, {pipeline_mode = #tpu.pipeline_mode<synchronous>, transform_indices = @transform_4, window_bounds = array<i64: 1, 128>}, {transform_indices = @transform_5, window_bounds = array<i64: 2, 128>}]} {
    %c0 = arith.constant 0 : index
    %c0_0 = arith.constant 0 : index
    %0 = vector.load %arg1[%c0, %c0_0] : memref<2x128xf32, #tpu.memory_space<vmem>>, vector<2x128xf32>
    %1 = arith.truncf %0 : vector<2x128xf32> to vector<2x128xbf16>
    %c0_1 = arith.constant 0 : index
    %c0_2 = arith.constant 0 : index
    %2 = vector.load %arg2[%c0_1, %c0_2] : memref<128x128xbf16, #tpu.memory_space<vmem>>, vector<128x128xbf16>
    %cst = arith.constant dense<0.000000e+00> : vector<2x128xf32>
    %3 = tpu.matmul %1, %2, %cst {dimension_numbers = #tpu.dot_dimension_numbers<[1], [0], [0], [1], [0, 0, 1, 1], [], []>} : vector<2x128xbf16>, vector<128x128xbf16>, vector<2x128xf32> -> vector<2x128xf32>
    %c0_3 = arith.constant 0 : index
    %c0_4 = arith.constant 0 : index
    %4 = vector.load %arg3[%c0_3, %c0_4] : memref<1x128xf32, #tpu.memory_space<vmem>>, vector<1x128xf32>
    %5 = vector.broadcast %4 : vector<1x128xf32> to vector<2x128xf32>
    %6 = arith.addf %3, %5 : vector<2x128xf32>
    %7 = math.tanh %6 : vector<2x128xf32>
    %8 = arith.truncf %7 : vector<2x128xf32> to vector<2x128xbf16>
    %c0_5 = arith.constant 0 : index
    %c0_6 = arith.constant 0 : index
    %9 = vector.load %arg4[%c0_5, %c0_6] : memref<128x128xbf16, #tpu.memory_space<vmem>>, vector<128x128xbf16>
    %cst_7 = arith.constant dense<0.000000e+00> : vector<2x128xf32>
    %10 = tpu.matmul %8, %9, %cst_7 {dimension_numbers = #tpu.dot_dimension_numbers<[1], [0], [0], [1], [0, 0, 1, 1], [], []>} : vector<2x128xbf16>, vector<128x128xbf16>, vector<2x128xf32> -> vector<2x128xf32>
    %c0_8 = arith.constant 0 : index
    %c0_9 = arith.constant 0 : index
    %11 = vector.load %arg5[%c0_8, %c0_9] : memref<1x128xf32, #tpu.memory_space<vmem>>, vector<1x128xf32>
    %12 = vector.broadcast %11 : vector<1x128xf32> to vector<2x128xf32>
    %13 = arith.addf %10, %12 : vector<2x128xf32>
    %c0_10 = arith.constant 0 : index
    %c0_11 = arith.constant 0 : index
    %14 = vector.load %arg6[%c0_10, %c0_11] : memref<2x128xf32, #tpu.memory_space<vmem>>, vector<2x128xf32>
    tpu.vector_store %arg6[%c0_10, %c0_11], %13 {strides = array<i32>} : memref<2x128xf32, #tpu.memory_space<vmem>>, vector<2x128xf32>,
    return
  }
  func.func @transform_0(%arg0: i32) -> (i32, i32) {
    %c0_i32 = arith.constant 0 : i32
    %c0_i32_0 = arith.constant 0 : i32
    return %arg0, %c0_i32 : i32, i32
  }
  func.func @transform_1(%arg0: i32) -> (i32, i32) {
    %c0_i32 = arith.constant 0 : i32
    %c0_i32_0 = arith.constant 0 : i32
    %c0_i32_1 = arith.constant 0 : i32
    return %c0_i32, %c0_i32_0 : i32, i32
  }
  func.func @transform_2(%arg0: i32) -> (i32, i32) {
    %c0_i32 = arith.constant 0 : i32
    %c0_i32_0 = arith.constant 0 : i32
    %c0_i32_1 = arith.constant 0 : i32
    return %c0_i32, %c0_i32_0 : i32, i32
  }
  func.func @transform_3(%arg0: i32) -> (i32, i32) {
    %c0_i32 = arith.constant 0 : i32
    %c0_i32_0 = arith.constant 0 : i32
    %c0_i32_1 = arith.constant 0 : i32
    return %c0_i32, %c0_i32_0 : i32, i32
  }
  func.func @transform_4(%arg0: i32) -> (i32, i32) {
    %c0_i32 = arith.constant 0 : i32
    %c0_i32_0 = arith.constant 0 : i32
    %c0_i32_1 = arith.constant 0 : i32
    return %c0_i32, %c0_i32_0 : i32, i32
  }
  func.func @transform_5(%arg0: i32) -> (i32, i32) {
    %c0_i32 = arith.constant 0 : i32
    %c0_i32_0 = arith.constant 0 : i32
    return %arg0, %c0_i32 : i32, i32
  }
}

</mosaic_0001>

<bundles_post_ra>
// kernel: tpu_custom_call.1
= control target key start
LH: loop header
LB: loop body
LE: loop exit
PB: predicated region body
PF: predicated region fallthrough
CT: control target
= control target key end

     0   :  { %10 = vsyncpa [#allocation3], 0  ;;  %s598_s0 = inlined_call_operand.hbm [shape: f32[2,128], index: 0, kind: input, shape index: {}]   ;;  %s599_s1 = inlined_call_operand.hbm [shape: bf16[128,128], index: 1, kind: input, shape index: {}]   ;;  %s600_s2 = inlined_call_operand.vmem [shape: f32[1,128], index: 2, kind: input, shape index: {}]   ;;  %s601_s3 = inlined_call_operand.hbm [shape: bf16[128,128], index: 3, kind: input, shape index: {}]   ;;  %s602_s4 = inlined_call_operand.vmem [shape: f32[1,128], index: 4, kind: input, shape index: {}]   ;;  %s603_s5 = inlined_call_operand.hbm [shape: f32[2,128], index: 5, kind: output, shape index: {}]  }
   0x1   :  { %11 = vsyncpa [#allocation6], 0 }
   0x2   :  { %12 = vsyncpa [#allocation4], 0  ;;  %s500_s18 = smov [#allocation5]   ;;  %s406_s22 = scalar_lea.hbm %s599_s1, 1024 }
   0x3   :  { %s28_s19 = sshll.u32 %s500_s18, 4  ;;  %p407_p0 = scmp.ne.s32.totalorder %s599_s1, %s406_s22  ;;  %s29_s19 = int_to_ptr.vmem [resolvable:$true] %s28_s19 }
   0x4   :  { %p410_p1 = scmp.lt.u32.totalorder %s406_s22, %s599_s1 }
   0x6   :  { %p412_p2 = pnand %p410_p1, %p407_p0 }
   0x8   :  { %415 = shalt.err (!%p412_p2)
}
   0x9   :  { %s416_s27 = scalar_lea.vmem %s29_s19, 1024  ;;  %p421_p4 = scmp.lt.s32.totalorder %s29_s19, %s29_s19 }
   0xa   :  { %p417_p3 = scmp.ne.s32.totalorder %s29_s19, %s416_s27  ;;  %p422_p5 = scmp.lt.s32.totalorder %s416_s27, %s416_s27 }
   0xc   :  { %p423_p6 = por %p422_p5, %p421_p4 }
   0xe   :  { %p424_p7 = pnand %p423_p6, %p417_p3 }
  0x10   :  { %427 = shalt.err (!%p424_p7)
}
  0x11   :  { %s501_s28 = smov 64   ;;  %s502_s29 = smov 4  }
  0x12   :  { %34 = dma.hbm_to_vmem [thread:$0]  %s599_s1, 1024, %s29_s19, [#allocation6], %s501_s28, %s501_s28, %s502_s29  }
  0x13   :  { %s503_s7 = smov [#allocation2]   ;;  %s504_s9 = smov [#allocation7]  }
  0x14   :  { %s19_s8 = sshll.u32 %s503_s7, 4  ;;  %s42_s10 = sshll.u32 %s504_s9, 4  ;;  %s20_s8 = int_to_ptr.vmem [resolvable:$true] %s19_s8  ;;  %s43_s10 = int_to_ptr.vmem [resolvable:$true] %s42_s10 }
  0x15   :  { %s428_s13 = scalar_lea.hbm %s598_s0, 32 }
  0x16   :  { %p429_p8 = scmp.ne.s32.totalorder %s598_s0, %s428_s13  ;;  %p432_p9 = scmp.lt.u32.totalorder %s428_s13, %s598_s0 }
  0x18   :  { %p434_p10 = pnand %p432_p9, %p429_p8 }
  0x1a   :  { %437 = shalt.err (!%p434_p10)
}
  0x1b   :  { %s438_s1 = scalar_lea.vmem %s20_s8, 32  ;;  %p443_p12 = scmp.lt.s32.totalorder %s20_s8, %s20_s8 }
  0x1c   :  { %p439_p11 = scmp.ne.s32.totalorder %s20_s8, %s438_s1  ;;  %p444_p13 = scmp.lt.s32.totalorder %s438_s1, %s438_s1 }
  0x1e   :  { %p445_p0 = por %p444_p13, %p443_p12 }
  0x20   :  { %p446_p1 = pnand %p445_p0, %p439_p11 }
  0x22   :  { %449 = shalt.err (!%p446_p1)
}
  0x23   :  { %22 = dma.hbm_to_vmem [thread:$0]  %s598_s0, 32, %s20_s8, [#allocation3]  }
  0x24   :  { %s450_s22 = scalar_lea.hbm %s601_s3, 1024 }
  0x25   :  { %p451_p2 = scmp.ne.s32.totalorder %s601_s3, %s450_s22  ;;  %p454_p3 = scmp.lt.u32.totalorder %s450_s22, %s601_s3 }
  0x27   :  { %p456_p4 = pnand %p454_p3, %p451_p2 }
  0x29   :  { %459 = shalt.err (!%p456_p4)
}
  0x2a   :  { %s460_s27 = scalar_lea.vmem %s43_s10, 1024  ;;  %p465_p6 = scmp.lt.s32.totalorder %s43_s10, %s43_s10 }
  0x2b   :  { %p461_p5 = scmp.ne.s32.totalorder %s43_s10, %s460_s27  ;;  %p466_p7 = scmp.lt.s32.totalorder %s460_s27, %s460_s27 }
  0x2d   :  { %p467_p8 = por %p466_p7, %p465_p6 }
  0x2f   :  { %p468_p9 = pnand %p467_p8, %p461_p5 }
  0x31   :  { %471 = shalt.err (!%p468_p9)
}
  0x32   :  { %48 = dma.hbm_to_vmem [thread:$0]  %s601_s3, 1024, %s43_s10, [#allocation6], %s501_s28, %s501_s28, %s502_s29  }
  0x33   :  { %494 = dma.done.wait [#allocation3], 32  }
  0x34   :  { %495 = vsyncadd [#allocation3], 4294967264 }
  0x35   :  { %496 = dma.done.wait [#allocation6], 2048  }
  0x36   :  { %497 = vsyncadd [#allocation6], 4294965248  ;;  %v505_v0 = vmov 0.0   ;;  %vm506_vm0 = vmmov 0   ;;  %v388_v1 = vld [vmem:[#allocation5] sm:$0xff]   ;;  %v389_v2 = vld [vmem:[#allocation5 + $0x8] sm:$0xff]  }
  0x37   :  { %340 = vmatprep.subr.bf16.mxu0 %v505_v0  ;;  %356 = vmatprep.mubr.msk.bf16.mxu0 %vm506_vm0, %v505_v0  ;;  %v390_v3 = vld [vmem:[#allocation5 + $0x10] sm:$0xff]   ;;  %v396_v4 = vld [vmem:[#allocation7] sm:$0xff]   ;;  %v391_v5 = vld [vmem:[#allocation5 + $0x18] sm:$0xff]   ;;  %s507_s7 = smov [#allocation8]  }
  0x38   :  { %360 = vmatprep.subr.bf16.mxu1 %v505_v0  ;;  %376 = vmatprep.mubr.msk.bf16.mxu1 %vm506_vm0, %v505_v0  ;;  %v397_v6 = vld [vmem:[#allocation7 + $0x8] sm:$0xff]   ;;  %v392_v7 = vld [vmem:[#allocation5 + $0x20] sm:$0xff]   ;;  %v398_v8 = vld [vmem:[#allocation7 + $0x10] sm:$0xff]   ;;  %s294_s8 = sshll.u32 %s507_s7, 4  ;;  %s295_s8 = int_to_ptr.vmem [resolvable:$true] %s294_s8 }
  0x39   :  { %341 = vmatpush3.bf16.msra.mxu0 %v388_v1  ;;  %361 = vmatpush3.bf16.msra.mxu1 %v396_v4  ;;  %v393_v9 = vld [vmem:[#allocation5 + $0x28] sm:$0xff]   ;;  %v399_v10 = vld [vmem:[#allocation7 + $0x18] sm:$0xff]   ;;  %v394_v11 = vld [vmem:[#allocation5 + $0x30] sm:$0xff]   ;;  %p477_p11 = scmp.lt.s32.totalorder %s295_s8, %s295_s8 }
  0x3a   :  { %342 = vmatprep.subr.bf16.mxu0 %v505_v0  ;;  %362 = vmatprep.subr.bf16.mxu1 %v505_v0  ;;  %v395_v12 = vld [vmem:[#allocation5 + $0x38] sm:$0xff]   ;;  %v400_v15 = vld [vmem:[#allocation7 + $0x20] sm:$0xff]   ;;  %v401_v16 = vld [vmem:[#allocation7 + $0x28] sm:$0xff]  }
  0x3b   :  { %v61_v13 = vld [vmem:[#allocation2] sm:$0x3]  ;;  %v402_v17 = vld [vmem:[#allocation7 + $0x30] sm:$0xff]  }
  0x3c   :  { %v62_v14 = vpack.c.bf16 %v61_v13, %v61_v13  ;;  %v403_v18 = vld [vmem:[#allocation7 + $0x38] sm:$0xff]  }
  0x3d   :  { %343 = vmatpush3.bf16.msra.mxu0 %v389_v2  ;;  %363 = vmatpush3.bf16.msra.mxu1 %v397_v6  ;;  %v304_v19 = vld [vmem:[%s600_s2] ss:$0 sm:$0xff]  ;;  %s472_s2 = scalar_lea.vmem %s295_s8, 32 }
  0x3e   :  { %344 = vmatprep.subr.bf16.mxu0 %v505_v0  ;;  %364 = vmatprep.subr.bf16.mxu1 %v505_v0  ;;  %v313_v27 = vld [vmem:[%s602_s4] ss:$0 sm:$0xff]  ;;  %p473_p10 = scmp.ne.s32.totalorder %s295_s8, %s472_s2  ;;  %p478_p12 = scmp.lt.s32.totalorder %s472_s2, %s472_s2 }
  0x40   :  { %p479_p13 = por %p478_p12, %p477_p11 }
  0x41   :  { %345 = vmatpush3.bf16.msra.mxu0 %v390_v3  ;;  %365 = vmatpush3.bf16.msra.mxu1 %v398_v8 }
  0x42   :  { %346 = vmatprep.subr.bf16.mxu0 %v505_v0  ;;  %366 = vmatprep.subr.bf16.mxu1 %v505_v0  ;;  %p480_p0 = pnand %p479_p13, %p473_p10 }
  0x45   :  { %347 = vmatpush3.bf16.msra.mxu0 %v391_v5  ;;  %367 = vmatpush3.bf16.msra.mxu1 %v399_v10 }
  0x46   :  { %348 = vmatprep.subr.bf16.mxu0 %v505_v0  ;;  %368 = vmatprep.subr.bf16.mxu1 %v505_v0 }
  0x49   :  { %349 = vmatpush3.bf16.msra.mxu0 %v392_v7  ;;  %369 = vmatpush3.bf16.msra.mxu1 %v400_v15 }
  0x4a   :  { %350 = vmatprep.subr.bf16.mxu0 %v505_v0  ;;  %370 = vmatprep.subr.bf16.mxu1 %v505_v0 }
  0x4d   :  { %351 = vmatpush3.bf16.msra.mxu0 %v393_v9  ;;  %371 = vmatpush3.bf16.msra.mxu1 %v401_v16 }
  0x4e   :  { %352 = vmatprep.subr.bf16.mxu0 %v505_v0  ;;  %372 = vmatprep.subr.bf16.mxu1 %v505_v0 }
  0x51   :  { %353 = vmatpush3.bf16.msra.mxu0 %v394_v11  ;;  %373 = vmatpush3.bf16.msra.mxu1 %v402_v17 }
  0x52   :  { %354 = vmatprep.subr.bf16.mxu0 %v505_v0  ;;  %374 = vmatprep.subr.bf16.mxu1 %v505_v0 }
  0x55   :  { %355 = vmatpush3.bf16.msra.mxu0 %v395_v12  ;;  %375 = vmatpush3.bf16.msra.mxu1 %v403_v18 }
  0x58   :  { %357 = vmatmul.mubr.bf16.vlgmr.msra.gmra.mrb[0].mxu0 %v62_v14 }
 0x12b   :  { %v168_v20 = vpop.f32.mrb[0].mxu0 }
 0x12c   :  { %v169_v21 = vadd.f32 %v304_v19, %v168_v20  ;;  %v358_v22 = vpop.f32.mrb[1].mxu0 }
 0x12d   :  { %v171_v23 = vpop.f32.mrb[2].mxu0 }
 0x12e   :  { %404 = vtanh.f32 %v169_v21  ;;  %v359_v24 = vpop.f32.mrb[3].mxu0 }
 0x138   :  { %v405_v25 = vpop.eup %404 }
 0x139   :  { %v175_v26 = vpack.c.bf16 %v405_v25, %v405_v25 }
 0x13b   :  { %377 = vmatmul.mubr.bf16.vlgmr.msra.gmra.mrb[0].mxu1 %v175_v26 }
 0x20e   :  { %v281_v28 = vpop.f32.mrb[0].mxu1 }
 0x20f   :  { %v282_v29 = vadd.f32 %v313_v27, %v281_v28  ;;  %v378_v30 = vpop.f32.mrb[1].mxu1 }
 0x210   :  { %v284_v31 = vpop.f32.mrb[2].mxu1 }
 0x211   :  { %287 = vst [vmem:[#allocation8] sm:$0x3] %v282_v29  ;;  %v379_v32 = vpop.f32.mrb[3].mxu1 }
 0x212   :  { %483 = shalt.err (!%p480_p0)
}
 0x213   :  { %s484_s4 = scalar_lea.hbm %s603_s5, 32 }
 0x214   :  { %p485_p1 = scmp.ne.s32.totalorder %s603_s5, %s484_s4  ;;  %p488_p2 = scmp.lt.u32.totalorder %s484_s4, %s603_s5 }
 0x216   :  { %p490_p3 = pnand %p488_p2, %p485_p1 }
 0x218   :  { %493 = shalt.err (!%p490_p3)
}
 0x219   :  { %297 = dma.vmem_to_hbm [thread:$0]  %s295_s8, 32, %s603_s5, [#allocation4]  }
 0x21a   :  { %498 = dma.done.wait [#allocation4], 32  }
 0x21b   :  { %499 = vsyncadd [#allocation4], 4294967264 }
 0x21c   :  { %301 = vsyncpa [#allocation3], 1 }
 0x21d   :  { %302 = vsyncpa [#allocation6], 1 }
 0x21e   :  { %303 = vsyncpa [#allocation4], 1 }

</bundles_post_ra>
